<compile_context>
chip_gen: v5e
topology: v5e:2x2
jax: 0.10.0
libtpu: 0.0.40
codegen_flags: <defaults>
</compile_context>

<pallas_src>
import functools

import jax
import jax.numpy as jnp
from jax import lax
from jax.experimental import pallas as pl
from jax.experimental.pallas import tpu as pltpu

_LANES = 128
_VMEM_BUDGET = 44 << 20   # conservative cap; fits v7x's 64 MiB physical VMEM


def _round_up(x, m):
    return ((x + m - 1) // m) * m


def _sublane_pack(dtype):
    # Sublane packing tile: 8 rows for 32-bit, 16 for 16-bit, 32 for 8-bit.
    return max(8, 32 // jnp.dtype(dtype).itemsize)


def _device_kind():
    try:
        return jax.devices()[0].device_kind.lower()
    except Exception:
        return ""


def _num_tensorcores(kind):
    # Single-TensorCore chips: v5e / v6e.  Dual-TC otherwise (v4/v5p/v7x).
    # TODO(synk): derive from pltpu.get_tpu_info() once a core-count field is stable.
    if any(t in kind for t in ("v5 lite", "v5e", "v5lite", "v6")):
        return 1
    return 2


def _target_block_bytes(kind):
    # Per-input, per-step DMA block sized against each generation's HBM speed
    # vs. the ~0.35us fixed per-grid-step overhead.
    if any(t in kind for t in ("v5 lite", "v5e", "v5lite")):
        return 1 << 20          # ~820 GB/s: 1 MiB already near roofline
    if "v6" in kind:
        return 2 << 20          # fits 32 MiB scoped-VMEM default w/o flags
    if "v7" in kind or "tpu7" in kind:
        return 4 << 20          # ~3.2 TB/s: amortize step overhead to ~10%
    return 2 << 20              # safe default for unknown chips


def _vmem_estimate(tile_rows, per_row_in_bytes):
    buffers = 2 * tile_rows * _LANES * per_row_in_bytes   # double-buffered inputs
    interm = 3 * tile_rows * _LANES * 4                   # f32 elementwise temps
    return buffers + interm + (1 << 20)


# ---------------------------------------------------------------------------
# Kernels
# ---------------------------------------------------------------------------

def _mse_partial_kernel(fake_ref, real_ref, out_ref, *, rows, tile_rows,
                        tiles_per_core):
    c = pl.program_id(0)             # TensorCore (parallel) axis
    i = pl.program_id(1)             # row-tile (sequential reduction) axis
    tile = c * tiles_per_core + i    # global row-tile index

    @pl.when(i == 0)
    def _init():
        out_ref[...] = jnp.zeros_like(out_ref)

    num_full = rows // tile_rows          # static: fully-valid tiles
    has_tail = (rows % tile_rows) != 0    # static: one ragged tail tile

    def _partial(masked):
        d = fake_ref[...].astype(jnp.float32) - real_ref[...].astype(jnp.float32)
        if masked:
            row_ids = tile * tile_rows + lax.broadcasted_iota(
                jnp.int32, (tile_rows, _LANES), 0)
            d = jnp.where(row_ids < rows, d, 0.0)
        dd = d * d
        # Fold sublane groups: pure vreg-wise VALU adds, no per-step XLU.
        return jnp.sum(dd.reshape(tile_rows // 8, 8, _LANES), axis=0)

    if num_full > 0:
        @pl.when(tile < num_full)          # steady state: no masking at all
        def _full_tile():
            out_ref[...] += _partial(masked=False)[None]

    if has_tail:
        @pl.when(tile == num_full)         # single ragged tail tile
        def _tail_tile():
            out_ref[...] += _partial(masked=True)[None]
    # tile beyond the last real tile (dummy clamped tile on an uneven core
    # split): no compute at all.


def _bce_partial_kernel(pred_ref, out_ref, *, rows, tile_rows):
    i = pl.program_id(0)

    @pl.when(i == 0)
    def _init():
        out_ref[...] = jnp.zeros_like(out_ref)

    num_full = rows // tile_rows
    has_tail = (rows % tile_rows) != 0

    def _partial(masked):
        # BCE-with-logits vs an all-ones target == softplus(-x), in the
        # numerically stable form max(-x, 0) + log1p(exp(-|x|)).
        x = pred_ref[...].astype(jnp.float32)
        sp = jnp.maximum(-x, 0.0) + jnp.log1p(jnp.exp(-jnp.abs(x)))
        if masked:
            row_ids = i * tile_rows + lax.broadcasted_iota(
                jnp.int32, (tile_rows, _LANES), 0)
            sp = jnp.where(row_ids < rows, sp, 0.0)
        return jnp.sum(sp.reshape(tile_rows // 8, 8, _LANES), axis=0)

    if num_full > 0:
        @pl.when(i < num_full)
        def _full_tile():
            out_ref[...] += _partial(masked=False)

    if has_tail:
        @pl.when(i == num_full)
        def _tail_tile():
            out_ref[...] += _partial(masked=True)


# ---------------------------------------------------------------------------
# Wrappers
# ---------------------------------------------------------------------------

def _to_lanes(x, pad_value):
    """Flatten row-major and reshape to (rows, 128).  Pads (one extra copy)
    only when the element count is not a multiple of 128."""
    n = x.size
    rows = _round_up(n, _LANES) // _LANES
    flat = x.reshape(-1)
    pad = rows * _LANES - n
    if pad:
        flat = jnp.pad(flat, (0, pad), constant_values=pad_value)
    return flat.reshape(rows, _LANES)


def _mse_partial_sums(fr, rr, tile_rows_arg):
    rows = fr.shape[0]
    kind = _device_kind()
    num_cores = _num_tensorcores(kind)
    pack = max(_sublane_pack(fr.dtype), _sublane_pack(rr.dtype))
    per_row_bytes = fr.dtype.itemsize + rr.dtype.itemsize

    if tile_rows_arg is None:
        target = _target_block_bytes(kind)
        widest = max(fr.dtype.itemsize, rr.dtype.itemsize)
        t = max(pack, target // (_LANES * widest))
        t = min(t, _round_up(rows, pack))
        # Shrink until the estimated footprint (double-buffered inputs + f32
        # compute intermediates) fits a conservative VMEM budget.
        while t > pack and _vmem_estimate(t, per_row_bytes) > _VMEM_BUDGET:
            t //= 2
        tile_rows = _round_up(t, pack)
    else:
        tile_rows = _round_up(
            min(max(tile_rows_arg, pack), _round_up(rows, pack)), pack)

    num_tiles = pl.cdiv(rows, tile_rows)
    tiles_per_core = pl.cdiv(num_tiles, num_cores)
    grid = (num_cores, tiles_per_core)

    def row_map(c, i):
        # Clamp dummy trailing tiles onto the last real block (they do no
        # compute) so the DMA never indexes out of bounds.
        return (jnp.minimum(c * tiles_per_core + i, num_tiles - 1), 0)

    kernel = functools.partial(
        _mse_partial_kernel, rows=rows, tile_rows=tile_rows,
        tiles_per_core=tiles_per_core)

    vmem_limit = int(min(
        max(32 << 20, _vmem_estimate(tile_rows, per_row_bytes) + (8 << 20)),
        56 << 20))

    cost = pl.CostEstimate(
        flops=3 * fr.size,
        transcendentals=0,
        bytes_accessed=int(fr.size * fr.dtype.itemsize
                           + rr.size * rr.dtype.itemsize
                           + num_cores * 8 * _LANES * 4),
    )

    return pl.pallas_call(
        kernel,
        out_shape=jax.ShapeDtypeStruct((num_cores, 8, _LANES), jnp.float32),
        grid_spec=pltpu.PrefetchScalarGridSpec(
            num_scalar_prefetch=0,
            grid=grid,
            in_specs=[
                pl.BlockSpec((tile_rows, _LANES), row_map),   # fake tile
                pl.BlockSpec((tile_rows, _LANES), row_map),   # real tile
            ],
            out_specs=pl.BlockSpec((1, 8, _LANES), lambda c, i: (c, 0, 0)),
        ),
        compiler_params=pltpu.CompilerParams(
            dimension_semantics=("parallel", "arbitrary"),
            vmem_limit_bytes=vmem_limit,
        ),
        cost_estimate=cost,
    )(fr, rr)


def _bce_partial_sums(pr):
    rows = pr.shape[0]
    pack = _sublane_pack(pr.dtype)
    tile_rows = _round_up(min(4096, _round_up(rows, pack)), pack)
    num_tiles = pl.cdiv(rows, tile_rows)

    kernel = functools.partial(_bce_partial_kernel, rows=rows,
                               tile_rows=tile_rows)

    cost = pl.CostEstimate(
        flops=5 * pr.size,
        transcendentals=2 * pr.size,
        bytes_accessed=int(pr.size * pr.dtype.itemsize + 8 * _LANES * 4),
    )

    return pl.pallas_call(
        kernel,
        out_shape=jax.ShapeDtypeStruct((8, _LANES), jnp.float32),
        grid_spec=pltpu.PrefetchScalarGridSpec(
            num_scalar_prefetch=0,
            grid=(num_tiles,),
            in_specs=[pl.BlockSpec((tile_rows, _LANES), lambda i: (i, 0))],
            out_specs=pl.BlockSpec((8, _LANES), lambda i: (0, 0)),
        ),
        compiler_params=pltpu.CompilerParams(
            dimension_semantics=("arbitrary",),
        ),
        cost_estimate=cost,
    )(pr)


@functools.partial(jax.jit, static_argnames=("alpha", "tile_rows"))
def gen_loss(fake, real, fake_pred, alpha=1.0, tile_rows=None):
    """Pallas implementation of GenLoss.forward(fake, real, fake_pred)."""
    assert fake.shape == real.shape
    n_fake = fake.size
    n_pred = fake_pred.size

    # Keep native dtypes: the kernels cast on-chip, so bf16 inputs stream at
    # half the HBM bytes of a pre-cast f32 copy.
    fr = _to_lanes(fake, 0)
    rr = _to_lanes(real, 0)
    # Pad pred with a huge positive logit: softplus(-1e9) == 0 exactly, so the
    # lane-padding does not perturb the BCE sum (means use original counts).
    pr = _to_lanes(fake_pred, 1e9)

    mse_part = _mse_partial_sums(fr, rr, tile_rows)
    bce_part = _bce_partial_sums(pr)

    mse_mean = jnp.sum(mse_part) / jnp.float32(n_fake)
    bce_mean = jnp.sum(bce_part) / jnp.float32(n_pred)
    return bce_mean + jnp.float32(alpha) * mse_mean


def _gen_loss_ref(fake, real, fake_pred, alpha=1.0):
    """Plain-JAX reference mirroring the PyTorch module."""
    x = fake_pred.astype(jnp.float32)
    bce = jnp.mean(jnp.maximum(-x, 0.0) + jnp.log1p(jnp.exp(-jnp.abs(x))))
    mse = jnp.mean((fake.astype(jnp.float32) - real.astype(jnp.float32)) ** 2)
    return bce + alpha * mse


if __name__ == "__main__":
    key = jax.random.PRNGKey(0)
    k1, k2, k3, k4, k5, k6 = jax.random.split(key, 6)

    # 1) Small GAN-like shapes (NCHW), element counts a multiple of 128.
    fake = jax.random.normal(k1, (2, 4, 16, 16), dtype=jnp.float32)
    real = jax.random.normal(k2, (2, 4, 16, 16), dtype=jnp.float32)
    pred = jax.random.normal(k3, (2, 1, 16, 16), dtype=jnp.float32)
    out = jax.block_until_ready(gen_loss(fake, real, pred, alpha=1.0))
    ref = _gen_loss_ref(fake, real, pred, alpha=1.0)
    assert jnp.allclose(out, ref, rtol=1e-5, atol=1e-5), (out, ref)

    # 2) Multi-tile path: force small tiles so the row axis splits into full
    #    tiles, a masked tail tile, and (on dual-core chips) a dummy tile.
    fake2 = jax.random.normal(k4, (2, 4, 20, 16), dtype=jnp.float32)  # 20 rows
    real2 = jax.random.normal(k5, (2, 4, 20, 16), dtype=jnp.float32)
    out2 = jax.block_until_ready(
        gen_loss(fake2, real2, pred, alpha=0.5, tile_rows=8))
    ref2 = _gen_loss_ref(fake2, real2, pred, alpha=0.5)
    assert jnp.allclose(out2, ref2, rtol=1e-5, atol=1e-5), (out2, ref2)

    # 3) Ragged element counts (not multiples of 128) and bf16 fake/real
    #    (tile rounded to the bf16 (16,128) packing tile).
    fake3 = jax.random.normal(k6, (2, 3, 5, 7), dtype=jnp.bfloat16)
    real3 = jax.random.normal(k1, (2, 3, 5, 7), dtype=jnp.bfloat16)
    pred3 = jax.random.normal(k2, (2, 1, 3, 3), dtype=jnp.float32)
    out3 = jax.block_until_ready(gen_loss(fake3, real3, pred3, alpha=2.0))
    ref3 = _gen_loss_ref(fake3, real3, pred3, alpha=2.0)
    assert jnp.allclose(out3, ref3, rtol=1e-4, atol=1e-4), (out3, ref3)

    print("KERNEL_OK")
</pallas_src>

<mosaic_0001>
module attributes {stable_mosaic.version = 11 : i64} {
  func.func @_mse_partial_kernel(%arg0: i32, %arg1: i32, %arg2: memref<16x128xf32, #tpu.memory_space<vmem>>, %arg3: memref<16x128xf32, #tpu.memory_space<vmem>>, %arg4: memref<1x8x128xf32, #tpu.memory_space<vmem>>) attributes {dimension_semantics = [#tpu.dimension_semantics<parallel>, #tpu.dimension_semantics<arbitrary>], iteration_bounds = array<i64: 2, 1>, scalar_prefetch = 0 : i64, scratch_operands = 0 : i64, tpu.core_type = #tpu.core_type<tc>, window_params = [{transform_indices = @transform_0, window_bounds = array<i64: 16, 128>}, {transform_indices = @transform_1, window_bounds = array<i64: 16, 128>}, {transform_indices = @transform_2, window_bounds = array<i64: 1, 8, 128>}]} {
    %c1_i32 = arith.constant 1 : i32
    %0 = arith.muli %arg0, %c1_i32 : i32
    %1 = arith.addi %0, %arg1 : i32
    %c0_i32 = arith.constant 0 : i32
    %2 = arith.cmpi eq, %arg1, %c0_i32 : i32
    %3 = arith.extui %2 : i1 to i32
    %c0_i32_0 = arith.constant 0 : i32
    %4 = arith.cmpi ne, %3, %c0_i32_0 : i32
    scf.if %4 {
      %cst = arith.constant 0.000000e+00 : f32
      %8 = vector.broadcast %cst : f32 to vector<1x8x128xf32>
      %c0 = arith.constant 0 : index
      %c0_3 = arith.constant 0 : index
      %c0_4 = arith.constant 0 : index
      %9 = vector.load %arg4[%c0, %c0_3, %c0_4] : memref<1x8x128xf32, #tpu.memory_space<vmem>>, vector<1x8x128xf32>
      tpu.vector_store %arg4[%c0, %c0_3, %c0_4], %8 {strides = array<i32>} : memref<1x8x128xf32, #tpu.memory_space<vmem>>, vector<1x8x128xf32>,
    } else {
    }
    %c1_i32_1 = arith.constant 1 : i32
    %5 = arith.cmpi slt, %1, %c1_i32_1 : i32
    %6 = arith.extui %5 : i1 to i32
    %c0_i32_2 = arith.constant 0 : i32
    %7 = arith.cmpi ne, %6, %c0_i32_2 : i32
    scf.if %7 {
      %c0 = arith.constant 0 : index
      %c0_3 = arith.constant 0 : index
      %c0_4 = arith.constant 0 : index
      %8 = vector.load %arg4[%c0, %c0_3, %c0_4] : memref<1x8x128xf32, #tpu.memory_space<vmem>>, vector<1x8x128xf32>
      %c0_5 = arith.constant 0 : index
      %c0_6 = arith.constant 0 : index
      %9 = vector.load %arg2[%c0_5, %c0_6] : memref<16x128xf32, #tpu.memory_space<vmem>>, vector<16x128xf32>
      %c0_7 = arith.constant 0 : index
      %c0_8 = arith.constant 0 : index
      %10 = vector.load %arg3[%c0_7, %c0_8] : memref<16x128xf32, #tpu.memory_space<vmem>>, vector<16x128xf32>
      %11 = arith.subf %9, %10 : vector<16x128xf32>
      %12 = arith.mulf %11, %11 : vector<16x128xf32>
      %13 = vector.shape_cast %12 : vector<16x128xf32> to vector<2x8x128xf32>
      %cst = arith.constant dense<0.000000e+00> : vector<8x128xf32>
      %14 = vector.multi_reduction <add>, %13, %cst [0] : vector<2x8x128xf32> to vector<8x128xf32>
      %15 = vector.shape_cast %14 : vector<8x128xf32> to vector<1x8x128xf32>
      %16 = arith.addf %8, %15 : vector<1x8x128xf32>
      %c0_9 = arith.constant 0 : index
      %c0_10 = arith.constant 0 : index
      %c0_11 = arith.constant 0 : index
      %17 = vector.load %arg4[%c0_9, %c0_10, %c0_11] : memref<1x8x128xf32, #tpu.memory_space<vmem>>, vector<1x8x128xf32>
      tpu.vector_store %arg4[%c0_9, %c0_10, %c0_11], %16 {strides = array<i32>} : memref<1x8x128xf32, #tpu.memory_space<vmem>>, vector<1x8x128xf32>,
    } else {
    }
    return
  }
  func.func @transform_0(%arg0: i32, %arg1: i32) -> (i32, i32) {
    %c1_i32 = arith.constant 1 : i32
    %0 = arith.muli %arg0, %c1_i32 : i32
    %1 = arith.addi %0, %arg1 : i32
    %c0_i32 = arith.constant 0 : i32
    %2 = arith.minsi %1, %c0_i32 : i32
    %c0_i32_0 = arith.constant 0 : i32
    %c0_i32_1 = arith.constant 0 : i32
    return %2, %c0_i32_0 : i32, i32
  }
  func.func @transform_1(%arg0: i32, %arg1: i32) -> (i32, i32) {
    %c1_i32 = arith.constant 1 : i32
    %0 = arith.muli %arg0, %c1_i32 : i32
    %1 = arith.addi %0, %arg1 : i32
    %c0_i32 = arith.constant 0 : i32
    %2 = arith.minsi %1, %c0_i32 : i32
    %c0_i32_0 = arith.constant 0 : i32
    %c0_i32_1 = arith.constant 0 : i32
    return %2, %c0_i32_0 : i32, i32
  }
  func.func @transform_2(%arg0: i32, %arg1: i32) -> (i32, i32, i32) {
    %c0_i32 = arith.constant 0 : i32
    %c0_i32_0 = arith.constant 0 : i32
    %c0_i32_1 = arith.constant 0 : i32
    return %arg0, %c0_i32, %c0_i32_0 : i32, i32, i32
  }
}

module attributes {stable_mosaic.version = 11 : i64} {
  func.func @_bce_partial_kernel(%arg0: i32, %arg1: memref<8x128xf32, #tpu.memory_space<vmem>>, %arg2: memref<8x128xf32, #tpu.memory_space<vmem>>) attributes {dimension_semantics = [#tpu.dimension_semantics<arbitrary>], iteration_bounds = array<i64: 1>, scalar_prefetch = 0 : i64, scratch_operands = 0 : i64, tpu.core_type = #tpu.core_type<tc>, window_params = [{transform_indices = @transform_0, window_bounds = array<i64: 8, 128>}, {pipeline_mode = #tpu.pipeline_mode<synchronous>, transform_indices = @transform_1, window_bounds = array<i64: 8, 128>}]} {
    %c0_i32 = arith.constant 0 : i32
    %0 = arith.cmpi eq, %arg0, %c0_i32 : i32
    %1 = arith.extui %0 : i1 to i32
    %c0_i32_0 = arith.constant 0 : i32
    %2 = arith.cmpi ne, %1, %c0_i32_0 : i32
    scf.if %2 {
      %cst = arith.constant 0.000000e+00 : f32
      %6 = vector.broadcast %cst : f32 to vector<8x128xf32>
      %c0 = arith.constant 0 : index
      %c0_3 = arith.constant 0 : index
      %7 = vector.load %arg2[%c0, %c0_3] : memref<8x128xf32, #tpu.memory_space<vmem>>, vector<8x128xf32>
      tpu.vector_store %arg2[%c0, %c0_3], %6 {strides = array<i32>} : memref<8x128xf32, #tpu.memory_space<vmem>>, vector<8x128xf32>,
    } else {
    }
    %c0_i32_1 = arith.constant 0 : i32
    %3 = arith.cmpi eq, %arg0, %c0_i32_1 : i32
    %4 = arith.extui %3 : i1 to i32
    %c0_i32_2 = arith.constant 0 : i32
    %5 = arith.cmpi ne, %4, %c0_i32_2 : i32
    scf.if %5 {
      %c0 = arith.constant 0 : index
      %c0_3 = arith.constant 0 : index
      %6 = vector.load %arg2[%c0, %c0_3] : memref<8x128xf32, #tpu.memory_space<vmem>>, vector<8x128xf32>
      %c0_4 = arith.constant 0 : index
      %c0_5 = arith.constant 0 : index
      %7 = vector.load %arg1[%c0_4, %c0_5] : memref<8x128xf32, #tpu.memory_space<vmem>>, vector<8x128xf32>
      %cst = arith.constant 0.000000e+00 : f32
      %8 = vector.broadcast %cst : f32 to vector<8x128xf32>
      %9 = arith.subf %8, %7 : vector<8x128xf32>
      %cst_6 = arith.constant 0.000000e+00 : f32
      %10 = vector.broadcast %cst_6 : f32 to vector<8x128xf32>
      %11 = arith.maximumf %9, %10 : vector<8x128xf32>
      %12 = math.absf %7 : vector<8x128xf32>
      %cst_7 = arith.constant 0.000000e+00 : f32
      %13 = vector.broadcast %cst_7 : f32 to vector<8x128xf32>
      %14 = arith.subf %13, %12 : vector<8x128xf32>
      %15 = math.exp %14 : vector<8x128xf32>
      %16 = math.log1p %15 : vector<8x128xf32>
      %17 = arith.addf %11, %16 : vector<8x128xf32>
      %c8_i32 = arith.constant 8 : i32
      %18 = arith.muli %arg0, %c8_i32 : i32
      %19 = tpu.iota {dimensions = array<i32: 0>} : vector<8x128xi32>
      %20 = vector.broadcast %18 : i32 to vector<8x128xi32>
      %21 = arith.addi %20, %19 : vector<8x128xi32>
      %c4_i32 = arith.constant 4 : i32
      %22 = vector.broadcast %c4_i32 : i32 to vector<8x128xi32>
      %23 = arith.cmpi slt, %21, %22 : vector<8x128xi32>
      %cst_8 = arith.constant 0.000000e+00 : f32
      %24 = vector.broadcast %cst_8 : f32 to vector<8x128xf32>
      %25 = arith.select %23, %17, %24 : vector<8x128xi1>, vector<8x128xf32>
      %26 = vector.shape_cast %25 : vector<8x128xf32> to vector<1x8x128xf32>
      %cst_9 = arith.constant dense<0.000000e+00> : vector<8x128xf32>
      %27 = vector.multi_reduction <add>, %26, %cst_9 [0] : vector<1x8x128xf32> to vector<8x128xf32>
      %28 = arith.addf %6, %27 : vector<8x128xf32>
      %c0_10 = arith.constant 0 : index
      %c0_11 = arith.constant 0 : index
      %29 = vector.load %arg2[%c0_10, %c0_11] : memref<8x128xf32, #tpu.memory_space<vmem>>, vector<8x128xf32>
      tpu.vector_store %arg2[%c0_10, %c0_11], %28 {strides = array<i32>} : memref<8x128xf32, #tpu.memory_space<vmem>>, vector<8x128xf32>,
    } else {
    }
    return
  }
  func.func @transform_0(%arg0: i32) -> (i32, i32) {
    %c0_i32 = arith.constant 0 : i32
    %c0_i32_0 = arith.constant 0 : i32
    return %arg0, %c0_i32 : i32, i32
  }
  func.func @transform_1(%arg0: i32) -> (i32, i32) {
    %c0_i32 = arith.constant 0 : i32
    %c0_i32_0 = arith.constant 0 : i32
    %c0_i32_1 = arith.constant 0 : i32
    return %c0_i32, %c0_i32_0 : i32, i32
  }
}

</mosaic_0001>

<bundles_post_ra>
// kernel: gen_loss.2
= control target key start
LH: loop header
LB: loop body
LE: loop exit
PB: predicated region body
PF: predicated region fallthrough
CT: control target
= control target key end

     0   :  { %s393_s9 = smov 0   ;;  %s395_s10 = smov 0   ;;  %s429_s0 = inlined_call_operand.vmem [shape: f32[16,128], index: 0, kind: input, shape index: {}]   ;;  %s430_s1 = inlined_call_operand.vmem [shape: f32[16,128], index: 1, kind: input, shape index: {}]   ;;  %s431_s2 = inlined_call_operand.vmem [shape: f32[2,8,128], index: 2, kind: output, shape index: {}]  }
   0x1   :  { %s397_s11 = smov 0  }
   0x2 LB: > { %s24_s12 = sadd.s32 1, %s371_s10  ;;  %p319_p0 = scmp.ge.s32.totalorder %s375_s11, 1  ;;  %s375_s11 = sphi %s397_s11, %s12_s11   ;;  %s371_s10 = sphi %s395_s10, %s433_s10   ;;  %s367_s9 = sphi %s393_s9, %s432_s9  }
   0x3   : > { %p26_p1 = scmp.ge.s32.totalorder %s24_s12, 2  ;;  %p160_p2 = scmp.lt.s32.totalorder %s375_s11, 3 }
   0x5   : > { %s435_s12 = smov (%p26_p1, %s24_s12), 0  ;;  %p161_p3 = pnand %p319_p0, %p160_p2 }
   0x6   : > { %p193_p4 = scmp.lt.s32.totalorder (!%p161_p3), %s367_s9, 0  ;;  %p216_p5 = scmp.lt.s32.totalorder (!%p161_p3), %s367_s9, 1 }
   0x7   : > { %164 = sbr.rel (%p161_p3) target bundleno = 32 (0x20), region = 28  ;;  %p325_p7 = scmp.ge.s32.totalorder (!%p161_p3), %s367_s9, 1 }
   0xc   : > { %s194_s13 = scalar_select %p193_p4, %s367_s9, 0  ;;  %v377_v0 = vmov 0.0  }
   0xd   : > { %s217_s14 = scalar_select %p216_p5, %s367_s9, 1 }
   0xe   : > { %s320_s15 = sshll.u32 %s194_s13, 1 }
   0xf   : > { %p196_p6 = scmp.lt.s32.totalorder %s320_s15, 1  ;;  %s324_s16 = sshll.u32 %s217_s14, 3 }
  0x10   : > { %s219_s19 = scalar_lea.vmem %s431_s2, %s324_s16  ;;  %229 = sbr.rel (%p325_p7) target bundleno = 32 (0x20), region = 36 }
  0x11   : > { %s437_s15 = smov (!%p196_p6, %s320_s15), 1  ;;  %225 = vst [vmem:[%s219_s19] sm:$0xff] %v377_v0 }
  0x12   : > { %s321_s20 = sshll.u32 %s437_s15, 3 }
  0x13   : > { %s199_s23 = scalar_lea.vmem %s429_s0, %s321_s20  ;;  %s211_s26 = scalar_lea.vmem %s430_s1, %s321_s20 }
  0x15   : > { %v231_v1 = vld [vmem:[%s199_s23] sm:$0xff]  ;;  %v232_v2 = vld [vmem:[%s199_s23 + $0x8] sm:$0xff] }
  0x16   : > { %v233_v3 = vld [vmem:[%s211_s26] sm:$0xff]  ;;  %v234_v4 = vld [vmem:[%s211_s26 + $0x8] sm:$0xff] }
  0x17   : > { %v235_v5 = vsub.f32 %v231_v1, %v233_v3  ;;  %v236_v6 = vsub.f32 %v232_v2, %v234_v4 }
  0x18   : > { %v230_v9 = vld [vmem:[%s219_s19] sm:$0xff] }
  0x19   : > { %v237_v7 = vmul.f32 %v235_v5, %v235_v5  ;;  %v238_v8 = vmul.f32 %v236_v6, %v236_v6 }
  0x1b   : > { %v239_v10 = vadd.f32 %v238_v8, %v237_v7 }
  0x1d   : > { %v240_v11 = vadd.f32 %v239_v10, %v230_v9 }
  0x1f   : > { %241 = vst [vmem:[%s219_s19] sm:$0xff] %v240_v11 }
  0x20 PF: > { %s12_s11 = sadd.s32 1, %s375_s11   ;;  %s432_s9 = smov %s371_s10 }
  0x21   : > { %p9_p8 = scmp.ge.s32.totalorder %s12_s11, 4   ;;  %s433_s10 = smov %s435_s12 }
  0x23   :  { %11 = sbr.rel (!%p9_p8) target bundleno = 2 (0x2), region = 69 }

// kernel: gen_loss.3
= control target key start
LH: loop header
LB: loop body
LE: loop exit
PB: predicated region body
PF: predicated region fallthrough
CT: control target
= control target key end

     0   :  { %v32_v8 = vlaneseq  ;;  %s66_s0 = inlined_call_operand.vmem [shape: f32[4,128], index: 0, kind: input, shape index: {}]   ;;  %s67_s1 = inlined_call_operand.vmem [shape: f32[8,128], index: 1, kind: output, shape index: {}]  }
   0x1   :  { %v14_v0 = vld [vmem:[%s66_s0] sm:$0xff] }
   0x2   :  { %v17_v1 = vand.u32 2147483647, %v14_v0  ;;  %v15_v9 = vsub.f32 0.0, %v14_v0  ;;  %v33_v12 = vshrl.u32 %v32_v8, 7 }
   0x4   :  { %v18_v2 = vsub.f32 0.0, %v17_v1  ;;  %v16_v14 = vmax.f32 %v15_v9, 0.0  ;;  %vm36_vm1 = vcmp.lt.s32.totalorder %v33_v12, 4 }
   0x6   :  { %v19_v3 = vmul.f32 1.442695, %v18_v2 }
   0x8   :  { %46 = vpow2.f32 %v19_v3 }
   0xe   :  { %v47_v4 = vpop.eup %46 }
   0xf   :  { %v21_v5 = vadd.f32 1.0, %v47_v4  ;;  %v24_v6 = vmul.f32 -0.5, %v47_v4  ;;  %v27_v10 = vand.u32 2147483647, %v47_v4 }
  0x11   :  { %48 = vlog2.f32 %v21_v5  ;;  %v25_v7 = vadd.f32 1.0, %v24_v6  ;;  %vm28_vm0 = vcmp.lt.f32.partialorder %v27_v10, 0.0004427343 }
  0x13   :  { %v26_v11 = vmul.f32 %v47_v4, %v25_v7 }
  0x17   :  { %v49_v13 = vpop.eup %48 }
  0x18   :  { %v23_v15 = vmul.f32 0.6931472, %v49_v13 }
  0x1a   :  { %v29_v16 = vsel %vm28_vm0, %v26_v11, %v23_v15 }
  0x1b   :  { %v30_v17 = vadd.f32 %v29_v16, %v16_v14 }
  0x1d   :  { %v37_v18 = vsel %vm36_vm1, %v30_v17, 0.0 }
  0x1e   :  { %40 = vst [vmem:[%s67_s1] sm:$0xff] %v37_v18 }

</bundles_post_ra>
